<compile_context>
chip_gen: v6e
topology: v6e:2x2x1
jax: 0.10.0
libtpu: 0.0.40
codegen_flags: <defaults>
</compile_context>

<pallas_src>
import math

import jax
import jax.numpy as jnp
from jax.experimental import pallas as pl
from jax.experimental.pallas import tpu as pltpu


def _copy_kernel(a_ref, o_ref):
    # Pure streaming copy: one read + one write per element, no compute.
    o_ref[...] = a_ref[...]


# Candidate lane widths (all multiples of 128), widest first.
_LANE_WIDTHS = (4096, 2048, 1024, 512, 256, 128)
# Target bytes per block (~4 MiB): amortizes the ~0.35 us per-grid-step
# overhead on v7x (3.2 TB/s) and is already past the v6e/v5e plateau.
_TARGET_BLOCK_BYTES = 4 * 1024 * 1024
# Force >= 2 grid steps once the array exceeds this (pipeline overlap +
# v7x megacore sharding of the "parallel" grid axis).
_MIN_STEPS = 2
_SPLIT_THRESHOLD_BYTES = 2 * 1024 * 1024
# Lane-axis tile cap for the fallback (total not divisible by 128) path.
_LANE_TILE_MAX = 8192


def _round_down(x, m):
    return (x // m) * m


def _pallas_copy_2d(a2d, tr, tc):
    """Streaming identity copy of a 2-D array with (tr, tc) blocks."""
    R, C = a2d.shape
    itemsize = jnp.dtype(a2d.dtype).itemsize
    # Per-buffer VMEM footprint of one block after (8, 128) layout padding.
    padded_block = (-(-tr // 8) * 8) * (-(-tc // 128) * 128) * itemsize
    # 2 buffers for the input + 2 for the output, plus headroom; capped well
    # inside v7x's 64 MiB physical VMEM (also overrides v5e's 16 MiB default).
    vmem_limit = int(min(max(8 * padded_block, 16 * 1024 * 1024),
                         48 * 1024 * 1024))
    return pl.pallas_call(
        _copy_kernel,
        out_shape=jax.ShapeDtypeStruct((R, C), a2d.dtype),
        grid_spec=pltpu.PrefetchScalarGridSpec(
            num_scalar_prefetch=0,
            grid=(pl.cdiv(R, tr), pl.cdiv(C, tc)),
            in_specs=[pl.BlockSpec((tr, tc), lambda i, j: (i, j))],
            out_specs=pl.BlockSpec((tr, tc), lambda i, j: (i, j)),
        ),
        compiler_params=pltpu.CompilerParams(
            dimension_semantics=("parallel", "parallel"),
            vmem_limit_bytes=vmem_limit,
        ),
    )(a2d)


def squeeze_dim0(a: jax.Array) -> jax.Array:
    """torch.squeeze(a, 0) as a Pallas TPU streaming copy.

    The squeeze itself is trace-time shape metadata. For the spec shape
    [4, 1, N] dim 0 has size 4, so the result is an identity; in production
    the copy can be elided entirely (just return `a`). The explicit Pallas
    copy below exists because this module's forward is the kernel.
    """
    if a.ndim == 0:
        return a
    out_shape = a.shape[1:] if a.shape[0] == 1 else a.shape

    L = math.prod(a.shape)
    if L == 0:
        return jnp.reshape(a, out_shape)

    itemsize = jnp.dtype(a.dtype).itemsize
    total_bytes = L * itemsize

    # --- Preferred path: contiguous (R, W) view, W a multiple of 128, row
    # tiles that are multiples of 8 sublanes (contiguous, unmasked DMAs). ----
    W = None
    for w in _LANE_WIDTHS:                     # widest W that fills 8 sublanes
        if L % w == 0 and L // w >= 8:
            W = w
            break
    if W is None:
        for w in _LANE_WIDTHS:                 # tiny input: any divisor works
            if L % w == 0:
                W = w
                break

    if W is not None:
        R = L // W
        a2d = jnp.reshape(a, (R, W))
        if R <= 8:
            tr = R                             # single full-extent block
        else:
            # ~4 MiB blocks, rounded down to a multiple of 8 rows.
            tr = max(8, _round_down(_TARGET_BLOCK_BYTES // (W * itemsize), 8))
            # Guarantee >= _MIN_STEPS grid steps for anything over ~2 MiB.
            if total_bytes > _SPLIT_THRESHOLD_BYTES:
                tr = min(tr, max(8, _round_down(R // _MIN_STEPS, 8)))
            tr = min(tr, _round_down(R, 8))
        out2d = _pallas_copy_2d(a2d, tr, W)
    else:
        # --- Fallback: total elements not a multiple of 128. Keep the natural
        # (prod(leading), last) view and tile the lane axis unconditionally:
        # no divisibility gate; cdiv grid + masking handles the remainder, so
        # a huge unaligned last dim can never exceed the VMEM budget.
        N2 = a.shape[-1]
        M2 = L // N2
        a2d = jnp.reshape(a, (M2, N2))
        tn = _LANE_TILE_MAX if N2 > _LANE_TILE_MAX else N2
        out2d = _pallas_copy_2d(a2d, M2, tn)

    return jnp.reshape(out2d, out_shape)


if __name__ == "__main__":
    key = jax.random.PRNGKey(0)

    # a: [4, 1, -1] float32 -> small example (4, 1, 256)
    a = jax.random.normal(key, (4, 1, 256), dtype=jnp.float32)

    out = squeeze_dim0(a)
    out = jax.block_until_ready(out)

    # torch.squeeze(a, 0) with a.shape[0] == 4 is a no-op -> identity.
    ref = a
    assert out.shape == ref.shape and out.dtype == ref.dtype
    assert jnp.array_equal(out, ref)

    print("KERNEL_OK")
</pallas_src>

<mosaic_0001>
module attributes {stable_mosaic.version = 11 : i64} {
  func.func @_copy_kernel(%arg0: i32, %arg1: i32, %arg2: memref<8x128xf32, #tpu.memory_space<vmem>>, %arg3: memref<8x128xf32, #tpu.memory_space<vmem>>) attributes {dimension_semantics = [#tpu.dimension_semantics<parallel>, #tpu.dimension_semantics<parallel>], iteration_bounds = array<i64: 1, 1>, scalar_prefetch = 0 : i64, scratch_operands = 0 : i64, tpu.core_type = #tpu.core_type<tc>, window_params = [{transform_indices = @transform_0, window_bounds = array<i64: 8, 128>}, {transform_indices = @transform_1, window_bounds = array<i64: 8, 128>}]} {
    %c0 = arith.constant 0 : index
    %c0_0 = arith.constant 0 : index
    %0 = vector.load %arg2[%c0, %c0_0] : memref<8x128xf32, #tpu.memory_space<vmem>>, vector<8x128xf32>
    %c0_1 = arith.constant 0 : index
    %c0_2 = arith.constant 0 : index
    %1 = vector.load %arg3[%c0_1, %c0_2] : memref<8x128xf32, #tpu.memory_space<vmem>>, vector<8x128xf32>
    tpu.vector_store %arg3[%c0_1, %c0_2], %0 {strides = array<i32>} : memref<8x128xf32, #tpu.memory_space<vmem>>, vector<8x128xf32>,
    return
  }
  func.func @transform_0(%arg0: i32, %arg1: i32) -> (i32, i32) {
    %c0_i32 = arith.constant 0 : i32
    return %arg0, %arg1 : i32, i32
  }
  func.func @transform_1(%arg0: i32, %arg1: i32) -> (i32, i32) {
    %c0_i32 = arith.constant 0 : i32
    return %arg0, %arg1 : i32, i32
  }
}

</mosaic_0001>

<bundles_post_ra>
// kernel: tpu_custom_call.1
= control target key start
LH: loop header
LB: loop body
LE: loop exit
PB: predicated region body
PF: predicated region fallthrough
CT: control target
= control target key end

     0   :  { %6 = vsyncpa [#allocation3], 0  ;;  %s102_s0 = inlined_call_operand.hbm [shape: f32[8,128], index: 0, kind: input, shape index: {}]   ;;  %s103_s1 = inlined_call_operand.hbm [shape: f32[8,128], index: 1, kind: output, shape index: {}]  }
   0x1   :  { %7 = vsyncpa [#allocation4], 0  ;;  %s84_s6 = smov [#allocation2]  }
   0x2   :  { %s14_s7 = sshll.u32 %s84_s6, 4  ;;  %s15_s7 = int_to_ptr.vmem [resolvable:$true] %s14_s7 }
   0x3   :  { %s48_s8 = scalar_lea.vmem %s15_s7, 128  ;;  %p53_p1 = scmp.lt.s32.totalorder %s15_s7, %s15_s7 }
   0x4   :  { %p49_p0 = scmp.ne.s32.totalorder %s15_s7, %s48_s8  ;;  %p54_p2 = scmp.lt.s32.totalorder %s48_s8, %s48_s8 }
   0x6   :  { %p55_p3 = por %p54_p2, %p53_p1 }
   0x8   :  { %p56_p4 = pnand %p55_p3, %p49_p0 }
   0xa   :  { %59 = shalt.err (!%p56_p4)
}
   0xb   :  { %17 = dma.hbm_to_vmem [thread:$0]  %s102_s0, 128, %s15_s7, [#allocation3]  }
   0xc   :  { %80 = dma.done.wait [#allocation3], 128  }
   0xd   :  { %81 = vsyncadd [#allocation3], 4294967168  ;;  %s85_s11 = smov [#allocation5]   ;;  %v21_v0 = vld [vmem:[#allocation2] sm:$0xff] }
   0xe   :  { %s29_s12 = sshll.u32 %s85_s11, 4  ;;  %22 = vst [vmem:[#allocation5] sm:$0xff] %v21_v0  ;;  %s30_s12 = int_to_ptr.vmem [resolvable:$true] %s29_s12 }
   0xf   :  { %s60_s13 = scalar_lea.vmem %s30_s12, 128  ;;  %p65_p6 = scmp.lt.s32.totalorder %s30_s12, %s30_s12 }
  0x10   :  { %p61_p5 = scmp.ne.s32.totalorder %s30_s12, %s60_s13  ;;  %p66_p7 = scmp.lt.s32.totalorder %s60_s13, %s60_s13 }
  0x12   :  { %p67_p8 = por %p66_p7, %p65_p6 }
  0x14   :  { %p68_p9 = pnand %p67_p8, %p61_p5 }
  0x16   :  { %71 = shalt.err (!%p68_p9)
}
  0x17   :  { %32 = dma.vmem_to_hbm [thread:$0]  %s30_s12, 128, %s103_s1, [#allocation4]  }
  0x18   :  { %82 = dma.done.wait [#allocation4], 128  }
  0x19   :  { %83 = vsyncadd [#allocation4], 4294967168 }
  0x1a   :  { %36 = vsyncpa [#allocation3], 1 }
  0x1b   :  { %37 = vsyncpa [#allocation4], 1 }

</bundles_post_ra>
